<compile_context>
chip_gen: v7x
topology: tpu7x:2x2x1
jax: 0.10.0
libtpu: 0.0.40
codegen_flags: <defaults>
</compile_context>

<pallas_src>
import jax
import jax.numpy as jnp
from jax.experimental import pallas as pl
from jax.experimental.pallas import tpu as pltpu


STATE_SIZE = 16
NUM_ACTIONS = 4
HIDDEN = 64

FUSED_H = 2 * HIDDEN   # 128 lanes: r-branch hidden in [0:64], v-branch in [64:128]
NOUT = 2               # column 0 = r_in, column 1 = v_ex
TM_MAX = 2048          # max batch tile (rows); tiny footprint even at 2048


def _round_up(n, m):
    return ((n + m - 1) // m) * m


def _pick_tile(batch, tm_max=TM_MAX):
    """Batch tile: multiple of 8, <= tm_max, and >=2 grid steps when possible
    so dimension_semantics=('parallel',) uses both v7x TensorCores."""
    half = _round_up(-(-batch // 2), 8)
    return max(8, min(tm_max, half))


# ---------------------------------------------------------------------------
# Kernel
# ---------------------------------------------------------------------------
def _fused_kernel(x_ref, a_ref, w1x_ref, w1a_ref, b1_ref,
                  w2_ref, b2_ref, w3_ref, b3_ref, o_ref):
    """Both branches in one 128-lane path; tanh applied only to the r_in lane.

    Matmuls run with bf16 operands (f32 accumulation); elementwise stays f32.
    """
    x = x_ref[...].astype(jnp.bfloat16)                                 # (tm, 16)
    a = a_ref[...].astype(jnp.bfloat16)                                 # (tm, 4)

    h = jnp.dot(x, w1x_ref[...], preferred_element_type=jnp.float32)
    h = h + jnp.dot(a, w1a_ref[...], preferred_element_type=jnp.float32)
    h = jnp.maximum(h + b1_ref[...], 0.0)                               # (tm, 128) f32

    h = jnp.dot(h.astype(jnp.bfloat16), w2_ref[...],
                preferred_element_type=jnp.float32)
    h = jnp.maximum(h + b2_ref[...], 0.0)                               # (tm, 128) f32

    out = jnp.dot(h.astype(jnp.bfloat16), w3_ref[...],
                  preferred_element_type=jnp.float32) + b3_ref[...]     # (tm, 2) f32

    col = jax.lax.broadcasted_iota(jnp.int32, out.shape, 1)
    o_ref[...] = jnp.where(col == 0, jnp.tanh(out), out)


# ---------------------------------------------------------------------------
# pallas_call wrapper
# ---------------------------------------------------------------------------
def _call_fused(x, a, fp, tm):
    B = x.shape[0]
    resident = lambda i: (0, 0)   # weights / biases stay VMEM-resident
    return pl.pallas_call(
        _fused_kernel,
        out_shape=jax.ShapeDtypeStruct((B, NOUT), jnp.float32),
        grid=(pl.cdiv(B, tm),),
        in_specs=[
            pl.BlockSpec((tm, STATE_SIZE), lambda i: (i, 0)),
            pl.BlockSpec((tm, NUM_ACTIONS), lambda i: (i, 0)),
            pl.BlockSpec((STATE_SIZE, FUSED_H), resident),
            pl.BlockSpec((NUM_ACTIONS, FUSED_H), resident),
            pl.BlockSpec((1, FUSED_H), resident),
            pl.BlockSpec((FUSED_H, FUSED_H), resident),
            pl.BlockSpec((1, FUSED_H), resident),
            pl.BlockSpec((FUSED_H, NOUT), resident),
            pl.BlockSpec((1, NOUT), resident),
        ],
        out_specs=pl.BlockSpec((tm, NOUT), lambda i: (i, 0)),
        compiler_params=pltpu.CompilerParams(dimension_semantics=("parallel",)),
    )(x, a, fp["w1x"], fp["w1a"], fp["b1"], fp["w2"], fp["b2"], fp["w3"], fp["b3"])


# ---------------------------------------------------------------------------
# Parameters
# ---------------------------------------------------------------------------
def _fuse_params(p):
    """Build fused 128-lane weights from per-branch weights (done once).

    W1 is split so x and actions can stay separate kernel inputs:
      w1x (16,128): rows = state features,  cols 0:64 r-branch, 64:128 v-branch
      w1a ( 4,128): rows = action features, cols 0:64 r-branch, 64:128 zero
    Matmul weights are bf16; biases stay f32.
    """
    S, A, H = STATE_SIZE, NUM_ACTIONS, HIDDEN

    w1x = jnp.zeros((S, FUSED_H), jnp.float32)
    w1x = w1x.at[:, :H].set(p["w1r"][:S, :])
    w1x = w1x.at[:, H:].set(p["w1v"])
    w1a = jnp.zeros((A, FUSED_H), jnp.float32)
    w1a = w1a.at[:, :H].set(p["w1r"][S:, :])
    b1 = jnp.concatenate([p["b1r"], p["b1v"]], axis=1)        # (1, 128)

    w2 = jnp.zeros((FUSED_H, FUSED_H), jnp.float32)           # block-diag
    w2 = w2.at[:H, :H].set(p["w2r"])
    w2 = w2.at[H:, H:].set(p["w2v"])
    b2 = jnp.concatenate([p["b2r"], p["b2v"]], axis=1)        # (1, 128)

    w3 = jnp.zeros((FUSED_H, NOUT), jnp.float32)              # block-diag head
    w3 = w3.at[:H, 0:1].set(p["wr"])
    w3 = w3.at[H:, 1:2].set(p["wv"])
    b3 = jnp.concatenate([p["br"], p["bv"]], axis=1)          # (1, 2)

    return dict(
        w1x=w1x.astype(jnp.bfloat16),
        w1a=w1a.astype(jnp.bfloat16),
        b1=b1,
        w2=w2.astype(jnp.bfloat16),
        b2=b2,
        w3=w3.astype(jnp.bfloat16),
        b3=b3,
    )


def init_params(key, state_size=STATE_SIZE, num_actions=NUM_ACTIONS, hidden=HIDDEN):
    """Deterministic PyTorch-Linear-style init (uniform(-1/sqrt(fan_in), +))."""
    def linear(k, fan_in, fan_out):
        kw, kb = jax.random.split(k)
        bound = 1.0 / jnp.sqrt(fan_in)
        w = jax.random.uniform(kw, (fan_in, fan_out), jnp.float32, -bound, bound)
        b = jax.random.uniform(kb, (1, fan_out), jnp.float32, -bound, bound)
        return w, b

    ks = jax.random.split(key, 6)
    w1r, b1r = linear(ks[0], state_size + num_actions, hidden)
    w2r, b2r = linear(ks[1], hidden, hidden)
    wr, br = linear(ks[2], hidden, 1)
    w1v, b1v = linear(ks[3], state_size, hidden)
    w2v, b2v = linear(ks[4], hidden, hidden)
    wv, bv = linear(ks[5], hidden, 1)

    # mimic `self.r_in.weight.data.mul_(0.1); self.r_in.bias.data.zero_()`
    wr = wr * 0.1
    br = jnp.zeros_like(br)
    wv = wv * 0.1
    bv = jnp.zeros_like(bv)

    p = dict(
        w1r=w1r, b1r=b1r, w2r=w2r, b2r=b2r, wr=wr, br=br,
        w1v=w1v, b1v=b1v, w2v=w2v, b2v=b2v, wv=wv, bv=bv,
    )
    p["fused"] = _fuse_params(p)
    return p


# ---------------------------------------------------------------------------
# Forward
# ---------------------------------------------------------------------------
def mlp_intrinsic_forward(params, x, actions, tm_max=TM_MAX):
    """Forward pass.  Returns (r_in, v_ex) like the torch module.

    x:       (B, state_size) float32
    actions: (B, num_actions) float32 or None
    """
    B = x.shape[0]
    tm = _pick_tile(B, tm_max)

    if actions is None:
        # Reuse the fused kernel with zeroed actions; the v-branch never sees
        # the action columns, so v_ex is exact, and r_in is simply dropped.
        a = jnp.zeros((B, NUM_ACTIONS), x.dtype)
        out = _call_fused(x, a, params["fused"], tm)
        return None, out[:, 1:2]

    out = _call_fused(x, actions, params["fused"], tm)        # (B, 2)
    return out[:, 0:1], out[:, 1:2]


def _reference(params, x, actions):
    """Pure-JAX f32 reference matching the PyTorch forward."""
    if actions is not None:
        h = jnp.concatenate([x, actions], axis=1)
        h = jax.nn.relu(h @ params["w1r"] + params["b1r"])
        h = jax.nn.relu(h @ params["w2r"] + params["b2r"])
        r_in = jnp.tanh(h @ params["wr"] + params["br"])
    else:
        r_in = None
    hv = jax.nn.relu(x @ params["w1v"] + params["b1v"])
    hv = jax.nn.relu(hv @ params["w2v"] + params["b2v"])
    v_ex = hv @ params["wv"] + params["bv"]
    return r_in, v_ex


if __name__ == "__main__":
    key = jax.random.PRNGKey(0)
    kp, kx, ka = jax.random.split(key, 3)

    params = init_params(kp)

    # bf16 MXU operands (f32 accumulation) -> relaxed tolerance vs f32 ref.
    ATOL, RTOL = 3e-2, 3e-2

    # --- main path (batch multiple of tile) ---
    batch = 8
    x = jax.random.normal(kx, (batch, STATE_SIZE), jnp.float32)
    actions = jax.random.normal(ka, (batch, NUM_ACTIONS), jnp.float32)

    r_in, v_ex = mlp_intrinsic_forward(params, x, actions)
    jax.block_until_ready((r_in, v_ex))

    r_ref, v_ref = _reference(params, x, actions)
    assert r_in.shape == (batch, 1) and v_ex.shape == (batch, 1)
    assert jnp.allclose(r_in, r_ref, atol=ATOL, rtol=RTOL), "r_in mismatch"
    assert jnp.allclose(v_ex, v_ref, atol=ATOL, rtol=RTOL), "v_ex mismatch"

    # --- actions=None path (fused kernel, zeroed actions) ---
    r_none, v_only = mlp_intrinsic_forward(params, x, None)
    jax.block_until_ready(v_only)
    assert r_none is None
    assert jnp.allclose(v_only, v_ref, atol=ATOL, rtol=RTOL), "v_ex (no-actions) mismatch"

    # --- ragged batch (exercises cdiv grid + masked last block) ---
    batch2 = 13
    kx2, ka2 = jax.random.split(jax.random.PRNGKey(1))
    x2 = jax.random.normal(kx2, (batch2, STATE_SIZE), jnp.float32)
    a2 = jax.random.normal(ka2, (batch2, NUM_ACTIONS), jnp.float32)
    r2, v2 = mlp_intrinsic_forward(params, x2, a2)
    jax.block_until_ready((r2, v2))
    r2_ref, v2_ref = _reference(params, x2, a2)
    assert r2.shape == (batch2, 1) and v2.shape == (batch2, 1)
    assert jnp.allclose(r2, r2_ref, atol=ATOL, rtol=RTOL), "ragged r_in mismatch"
    assert jnp.allclose(v2, v2_ref, atol=ATOL, rtol=RTOL), "ragged v_ex mismatch"

    print("KERNEL_OK")
</pallas_src>

<mosaic_0001>
module attributes {stable_mosaic.version = 11 : i64} {
  func.func @_fused_kernel(%arg0: i32, %arg1: memref<8x16xf32, #tpu.memory_space<vmem>>, %arg2: memref<8x4xf32, #tpu.memory_space<vmem>>, %arg3: memref<16x128xbf16, #tpu.memory_space<vmem>>, %arg4: memref<4x128xbf16, #tpu.memory_space<vmem>>, %arg5: memref<1x128xf32, #tpu.memory_space<vmem>>, %arg6: memref<128x128xbf16, #tpu.memory_space<vmem>>, %arg7: memref<1x128xf32, #tpu.memory_space<vmem>>, %arg8: memref<128x2xbf16, #tpu.memory_space<vmem>>, %arg9: memref<1x2xf32, #tpu.memory_space<vmem>>, %arg10: memref<8x2xf32, #tpu.memory_space<vmem>>) attributes {dimension_semantics = [#tpu.dimension_semantics<parallel>], iteration_bounds = array<i64: 1>, scalar_prefetch = 0 : i64, scratch_operands = 0 : i64, tpu.core_type = #tpu.core_type<tc>, window_params = [{transform_indices = @transform_0, window_bounds = array<i64: 8, 16>}, {transform_indices = @transform_1, window_bounds = array<i64: 8, 4>}, {pipeline_mode = #tpu.pipeline_mode<synchronous>, transform_indices = @transform_2, window_bounds = array<i64: 16, 128>}, {pipeline_mode = #tpu.pipeline_mode<synchronous>, transform_indices = @transform_3, window_bounds = array<i64: 4, 128>}, {pipeline_mode = #tpu.pipeline_mode<synchronous>, transform_indices = @transform_4, window_bounds = array<i64: 1, 128>}, {pipeline_mode = #tpu.pipeline_mode<synchronous>, transform_indices = @transform_5, window_bounds = array<i64: 128, 128>}, {pipeline_mode = #tpu.pipeline_mode<synchronous>, transform_indices = @transform_6, window_bounds = array<i64: 1, 128>}, {pipeline_mode = #tpu.pipeline_mode<synchronous>, transform_indices = @transform_7, window_bounds = array<i64: 128, 2>}, {pipeline_mode = #tpu.pipeline_mode<synchronous>, transform_indices = @transform_8, window_bounds = array<i64: 1, 2>}, {transform_indices = @transform_9, window_bounds = array<i64: 8, 2>}]} {
    %c0 = arith.constant 0 : index
    %c0_0 = arith.constant 0 : index
    %0 = vector.load %arg1[%c0, %c0_0] : memref<8x16xf32, #tpu.memory_space<vmem>>, vector<8x16xf32>
    %1 = arith.truncf %0 : vector<8x16xf32> to vector<8x16xbf16>
    %c0_1 = arith.constant 0 : index
    %c0_2 = arith.constant 0 : index
    %2 = vector.load %arg2[%c0_1, %c0_2] : memref<8x4xf32, #tpu.memory_space<vmem>>, vector<8x4xf32>
    %3 = arith.truncf %2 : vector<8x4xf32> to vector<8x4xbf16>
    %c0_3 = arith.constant 0 : index
    %c0_4 = arith.constant 0 : index
    %4 = vector.load %arg3[%c0_3, %c0_4] : memref<16x128xbf16, #tpu.memory_space<vmem>>, vector<16x128xbf16>
    %cst = arith.constant dense<0.000000e+00> : vector<8x128xf32>
    %5 = tpu.matmul %1, %4, %cst {dimension_numbers = #tpu.dot_dimension_numbers<[1], [0], [0], [1], [0, 0, 1, 1], [], []>} : vector<8x16xbf16>, vector<16x128xbf16>, vector<8x128xf32> -> vector<8x128xf32>
    %c0_5 = arith.constant 0 : index
    %c0_6 = arith.constant 0 : index
    %6 = vector.load %arg4[%c0_5, %c0_6] : memref<4x128xbf16, #tpu.memory_space<vmem>>, vector<4x128xbf16>
    %cst_7 = arith.constant dense<0.000000e+00> : vector<8x128xf32>
    %7 = tpu.matmul %3, %6, %cst_7 {dimension_numbers = #tpu.dot_dimension_numbers<[1], [0], [0], [1], [0, 0, 1, 1], [], []>} : vector<8x4xbf16>, vector<4x128xbf16>, vector<8x128xf32> -> vector<8x128xf32>
    %8 = arith.addf %5, %7 : vector<8x128xf32>
    %c0_8 = arith.constant 0 : index
    %c0_9 = arith.constant 0 : index
    %9 = vector.load %arg5[%c0_8, %c0_9] : memref<1x128xf32, #tpu.memory_space<vmem>>, vector<1x128xf32>
    %10 = vector.broadcast %9 : vector<1x128xf32> to vector<8x128xf32>
    %11 = arith.addf %8, %10 : vector<8x128xf32>
    %cst_10 = arith.constant 0.000000e+00 : f32
    %12 = vector.broadcast %cst_10 : f32 to vector<8x128xf32>
    %13 = arith.maximumf %11, %12 : vector<8x128xf32>
    %14 = arith.truncf %13 : vector<8x128xf32> to vector<8x128xbf16>
    %c0_11 = arith.constant 0 : index
    %c0_12 = arith.constant 0 : index
    %15 = vector.load %arg6[%c0_11, %c0_12] : memref<128x128xbf16, #tpu.memory_space<vmem>>, vector<128x128xbf16>
    %cst_13 = arith.constant dense<0.000000e+00> : vector<8x128xf32>
    %16 = tpu.matmul %14, %15, %cst_13 {dimension_numbers = #tpu.dot_dimension_numbers<[1], [0], [0], [1], [0, 0, 1, 1], [], []>} : vector<8x128xbf16>, vector<128x128xbf16>, vector<8x128xf32> -> vector<8x128xf32>
    %c0_14 = arith.constant 0 : index
    %c0_15 = arith.constant 0 : index
    %17 = vector.load %arg7[%c0_14, %c0_15] : memref<1x128xf32, #tpu.memory_space<vmem>>, vector<1x128xf32>
    %18 = vector.broadcast %17 : vector<1x128xf32> to vector<8x128xf32>
    %19 = arith.addf %16, %18 : vector<8x128xf32>
    %cst_16 = arith.constant 0.000000e+00 : f32
    %20 = vector.broadcast %cst_16 : f32 to vector<8x128xf32>
    %21 = arith.maximumf %19, %20 : vector<8x128xf32>
    %22 = arith.truncf %21 : vector<8x128xf32> to vector<8x128xbf16>
    %c0_17 = arith.constant 0 : index
    %c0_18 = arith.constant 0 : index
    %23 = vector.load %arg8[%c0_17, %c0_18] : memref<128x2xbf16, #tpu.memory_space<vmem>>, vector<128x2xbf16>
    %cst_19 = arith.constant dense<0.000000e+00> : vector<8x2xf32>
    %24 = tpu.matmul %22, %23, %cst_19 {dimension_numbers = #tpu.dot_dimension_numbers<[1], [0], [0], [1], [0, 0, 1, 1], [], []>} : vector<8x128xbf16>, vector<128x2xbf16>, vector<8x2xf32> -> vector<8x2xf32>
    %c0_20 = arith.constant 0 : index
    %c0_21 = arith.constant 0 : index
    %25 = vector.load %arg9[%c0_20, %c0_21] : memref<1x2xf32, #tpu.memory_space<vmem>>, vector<1x2xf32>
    %26 = vector.broadcast %25 : vector<1x2xf32> to vector<8x2xf32>
    %27 = arith.addf %24, %26 : vector<8x2xf32>
    %28 = tpu.iota {dimensions = array<i32: 1>} : vector<8x2xi32>
    %c0_i32 = arith.constant 0 : i32
    %29 = vector.broadcast %c0_i32 : i32 to vector<8x2xi32>
    %30 = arith.cmpi eq, %28, %29 : vector<8x2xi32>
    %31 = math.tanh %27 : vector<8x2xf32>
    %32 = arith.select %30, %31, %27 : vector<8x2xi1>, vector<8x2xf32>
    %c0_22 = arith.constant 0 : index
    %c0_23 = arith.constant 0 : index
    %33 = vector.load %arg10[%c0_22, %c0_23] : memref<8x2xf32, #tpu.memory_space<vmem>>, vector<8x2xf32>
    tpu.vector_store %arg10[%c0_22, %c0_23], %32 {strides = array<i32>} : memref<8x2xf32, #tpu.memory_space<vmem>>, vector<8x2xf32>,
    return
  }
  func.func @transform_0(%arg0: i32) -> (i32, i32) {
    %c0_i32 = arith.constant 0 : i32
    %c0_i32_0 = arith.constant 0 : i32
    return %arg0, %c0_i32 : i32, i32
  }
  func.func @transform_1(%arg0: i32) -> (i32, i32) {
    %c0_i32 = arith.constant 0 : i32
    %c0_i32_0 = arith.constant 0 : i32
    return %arg0, %c0_i32 : i32, i32
  }
  func.func @transform_2(%arg0: i32) -> (i32, i32) {
    %c0_i32 = arith.constant 0 : i32
    %c0_i32_0 = arith.constant 0 : i32
    %c0_i32_1 = arith.constant 0 : i32
    return %c0_i32, %c0_i32_0 : i32, i32
  }
  func.func @transform_3(%arg0: i32) -> (i32, i32) {
    %c0_i32 = arith.constant 0 : i32
    %c0_i32_0 = arith.constant 0 : i32
    %c0_i32_1 = arith.constant 0 : i32
    return %c0_i32, %c0_i32_0 : i32, i32
  }
  func.func @transform_4(%arg0: i32) -> (i32, i32) {
    %c0_i32 = arith.constant 0 : i32
    %c0_i32_0 = arith.constant 0 : i32
    %c0_i32_1 = arith.constant 0 : i32
    return %c0_i32, %c0_i32_0 : i32, i32
  }
  func.func @transform_5(%arg0: i32) -> (i32, i32) {
    %c0_i32 = arith.constant 0 : i32
    %c0_i32_0 = arith.constant 0 : i32
    %c0_i32_1 = arith.constant 0 : i32
    return %c0_i32, %c0_i32_0 : i32, i32
  }
  func.func @transform_6(%arg0: i32) -> (i32, i32) {
    %c0_i32 = arith.constant 0 : i32
    %c0_i32_0 = arith.constant 0 : i32
    %c0_i32_1 = arith.constant 0 : i32
    return %c0_i32, %c0_i32_0 : i32, i32
  }
  func.func @transform_7(%arg0: i32) -> (i32, i32) {
    %c0_i32 = arith.constant 0 : i32
    %c0_i32_0 = arith.constant 0 : i32
    %c0_i32_1 = arith.constant 0 : i32
    return %c0_i32, %c0_i32_0 : i32, i32
  }
  func.func @transform_8(%arg0: i32) -> (i32, i32) {
    %c0_i32 = arith.constant 0 : i32
    %c0_i32_0 = arith.constant 0 : i32
    %c0_i32_1 = arith.constant 0 : i32
    return %c0_i32, %c0_i32_0 : i32, i32
  }
  func.func @transform_9(%arg0: i32) -> (i32, i32) {
    %c0_i32 = arith.constant 0 : i32
    %c0_i32_0 = arith.constant 0 : i32
    return %arg0, %c0_i32 : i32, i32
  }
}

</mosaic_0001>

<bundles_post_ra>
// kernel: tpu_custom_call.1
= control target key start
LH: loop header
LB: loop body
LE: loop exit
PB: predicated region body
PF: predicated region fallthrough
CT: control target
= control target key end

     0   :  { %vm44_vm0 = vcmask 1041408   ;;  %v500_v0 = vmov 0.0   ;;  %vm501_vm1 = vmmov 0   ;;  %vm40_vm2 = vcmask 31744   ;;  %s650_s3 = inlined_call_operand.vmem [shape: bf16[4,128], index: 3, kind: input, shape index: {}]   ;;  %s651_s2 = inlined_call_operand.vmem [shape: bf16[16,128], index: 2, kind: input, shape index: {}]   ;;  %s652_s1 = inlined_call_operand.vmem [shape: f32[8,4], index: 1, kind: input, shape index: {}]   ;;  %s653_s0 = inlined_call_operand.vmem [shape: f32[8,16], index: 0, kind: input, shape index: {}]   ;;  %s654_s5 = inlined_call_operand.vmem [shape: bf16[128,128], index: 5, kind: input, shape index: {}]   ;;  %s655_s7 = inlined_call_operand.vmem [shape: bf16[128,2], index: 7, kind: input, shape index: {}]   ;;  %s656_s4 = inlined_call_operand.vmem [shape: f32[1,128], index: 4, kind: input, shape index: {}]   ;;  %s657_s6 = inlined_call_operand.vmem [shape: f32[1,128], index: 6, kind: input, shape index: {}]   ;;  %s658_s8 = inlined_call_operand.vmem [shape: f32[1,2], index: 8, kind: input, shape index: {}]   ;;  %s659_s9 = inlined_call_operand.vmem [shape: f32[8,2], index: 9, kind: output, shape index: {}]  }
   0x1   :  { %427 = vmatprep.subr.bf16.mxu0 %v500_v0  ;;  %v39_v1 = vld [vmem:[%s650_s3] sm:$0x3]  ;;  %433 = vmatprep.subr.bf16.mxu1 %v500_v0  ;;  %vm94_vm3 = vcmask 130048   ;;  %v483_v9 = vld [vmem:[%s654_s5 + $0x8] sm:$0xff]   ;;  %v484_v10 = vld [vmem:[%s654_s5 + $0x10] sm:$0xff]   ;;  %v372_v50 = vlaneseq  ;;  %vm377_vm5 = vcmask 15360  }
   0x2   :  { %v46_v2 = vsel %vm44_vm0, %v39_v1, 0  ;;  %v481_v3 = vld [vmem:[%s651_s2] sm:$0xff]   ;;  %429 = vmatprep.mubr.msk.bf16.mxu0 %vm501_vm1, %v500_v0  ;;  %435 = vmatprep.mubr.msk.bf16.mxu1 %vm501_vm1, %v500_v0  ;;  %v485_v11 = vld [vmem:[%s654_s5 + $0x18] sm:$0xff]   ;;  %v487_v13 = vld [vmem:[%s654_s5 + $0x28] sm:$0xff]  }
   0x3   :  { %v35_v4 = vld [vmem:[%s652_s1] sm:$0xff]  ;;  %428 = vmatpush3.bf16.msra.mxu0 %v46_v2  ;;  %434 = vmatpush3.bf16.msra.mxu1 %v481_v3  ;;  %v488_v14 = vld [vmem:[%s654_s5 + $0x30] sm:$0xff]   ;;  %v489_v15 = vld [vmem:[%s654_s5 + $0x38] sm:$0xff]   ;;  %v373_v52 = vand.u32 127, %v372_v50 }
   0x4   :  { %v33_v5 = vld [vmem:[%s653_s0] sm:$0xff]  ;;  %v36_v6 = vpack.c.bf16 %v35_v4, %v35_v4  ;;  %439 = vmatprep.subr.bf16.mxu0 %v500_v0  ;;  %459 = vmatprep.subr.bf16.mxu1 %v500_v0  ;;  %v491_v17 = vld [vmem:[%s655_s7 + $0x8] sm:$0xff]   ;;  %v492_v18 = vld [vmem:[%s655_s7 + $0x10] sm:$0xff]  }
   0x5   :  { %v34_v7 = vpack.c.bf16 %v33_v5, %v33_v5  ;;  %v482_v8 = vld [vmem:[%s654_s5] sm:$0xff]   ;;  %v493_v19 = vld [vmem:[%s655_s7 + $0x18] sm:$0xff]   ;;  %v495_v21 = vld [vmem:[%s655_s7 + $0x28] sm:$0xff]   ;;  %vm374_vm4 = vcmp.eq.s32.totalorder %v373_v52, 0 }
   0x6   :  { %430 = vmatmul.mubr.msk.bf16.vlgmr.msra.gmra.mrb[0].mxu0 %vm40_vm2, %v36_v6  ;;  %v486_v12 = vld [vmem:[%s654_s5 + $0x20] sm:$0xff]   ;;  %v496_v35 = vld [vmem:[%s655_s7 + $0x30] sm:$0xff]   ;;  %v497_v36 = vld [vmem:[%s655_s7 + $0x38] sm:$0xff]  }
   0x7   :  { %436 = vmatmul.mubr.msk.bf16.vlgmr.msra.gmra.mrb[0].mxu1 %vm94_vm3, %v34_v7  ;;  %440 = vmatpush3.bf16.msra.mxu0 %v482_v8  ;;  %v490_v16 = vld [vmem:[%s655_s7] sm:$0xff]  }
   0x8   :  { %441 = vmatprep.subr.bf16.mxu0 %v500_v0  ;;  %455 = vmatprep.mubr.msk.bf16.mxu0 %vm501_vm1, %v500_v0  ;;  %v494_v20 = vld [vmem:[%s655_s7 + $0x20] sm:$0xff]  }
   0x9   :  { %475 = vmatprep.mubr.msk.bf16.mxu1 %vm501_vm1, %v500_v0  ;;  %460 = vmatpush3.bf16.msra.mxu1 %v490_v16  ;;  %v386_v25 = vld [vmem:[%s656_s4] ss:$0 sm:$0xff] }
   0xa   :  { %461 = vmatprep.subr.bf16.mxu1 %v500_v0  ;;  %v387_v37 = vld [vmem:[%s657_s6] ss:$0 sm:$0xff] }
   0xb   :  { %442 = vmatpush3.bf16.msra.mxu0 %v483_v9  ;;  %v396_v45 = vld [vmem:[%s658_s8] ss:$0 sm:$0xff] }
   0xc   :  { %443 = vmatprep.subr.bf16.mxu0 %v500_v0 }
   0xd   :  { %462 = vmatpush3.bf16.msra.mxu1 %v491_v17 }
   0xe   :  { %463 = vmatprep.subr.bf16.mxu1 %v500_v0 }
   0xf   :  { %444 = vmatpush3.bf16.msra.mxu0 %v484_v10 }
  0x10   :  { %445 = vmatprep.subr.bf16.mxu0 %v500_v0 }
  0x11   :  { %464 = vmatpush3.bf16.msra.mxu1 %v492_v18 }
  0x12   :  { %465 = vmatprep.subr.bf16.mxu1 %v500_v0 }
  0x13   :  { %446 = vmatpush3.bf16.msra.mxu0 %v485_v11 }
  0x14   :  { %447 = vmatprep.subr.bf16.mxu0 %v500_v0 }
  0x15   :  { %466 = vmatpush3.bf16.msra.mxu1 %v493_v19 }
  0x16   :  { %467 = vmatprep.subr.bf16.mxu1 %v500_v0 }
  0x17   :  { %448 = vmatpush3.bf16.msra.mxu0 %v486_v12 }
  0x18   :  { %449 = vmatprep.subr.bf16.mxu0 %v500_v0 }
  0x19   :  { %468 = vmatpush3.bf16.msra.mxu1 %v494_v20 }
  0x1a   :  { %469 = vmatprep.subr.bf16.mxu1 %v500_v0 }
  0x1b   :  { %450 = vmatpush3.bf16.msra.mxu0 %v487_v13 }
  0x1c   :  { %451 = vmatprep.subr.bf16.mxu0 %v500_v0 }
  0x1d   :  { %470 = vmatpush3.bf16.msra.mxu1 %v495_v21 }
  0x1e   :  { %471 = vmatprep.subr.bf16.mxu1 %v500_v0 }
  0x1f   :  { %452 = vmatpush3.bf16.msra.mxu0 %v488_v14 }
  0x20   :  { %453 = vmatprep.subr.bf16.mxu0 %v500_v0 }
  0x21   :  { %472 = vmatpush3.bf16.msra.mxu1 %v496_v35 }
  0x22   :  { %473 = vmatprep.subr.bf16.mxu1 %v500_v0 }
  0x23   :  { %454 = vmatpush3.bf16.msra.mxu0 %v489_v15 }
  0x25   :  { %474 = vmatpush3.bf16.msra.mxu1 %v497_v36 }
  0xd9   :  { %v82_v22 = vpop.f32.mrb[0].mxu0 }
  0xda   :  { %v431_v23 = vpop.f32.mrb[1].mxu0  ;;  %v132_v24 = vpop.f32.mrb[0].mxu1 }
  0xdb   :  { %v133_v26 = vadd.f32 %v132_v24, %v82_v22  ;;  %v85_v27 = vpop.f32.mrb[2].mxu0  ;;  %v437_v28 = vpop.f32.mrb[1].mxu1 }
  0xdc   :  { %v432_v29 = vpop.f32.mrb[3].mxu0  ;;  %v135_v30 = vpop.f32.mrb[2].mxu1 }
  0xdd   :  { %v145_v31 = vadd.f32 %v386_v25, %v133_v26  ;;  %v438_v32 = vpop.f32.mrb[3].mxu1 }
  0xdf   :  { %v146_v33 = vmax.f32 %v145_v31, 0.0 }
  0xe1   :  { %v147_v34 = vpack.c.bf16 %v146_v33, %v146_v33 }
  0xe3   :  { %456 = vmatmul.mubr.bf16.vlgmr.msra.gmra.mrb[4].mxu0 %v147_v34 }
 0x1b6   :  { %v253_v38 = vpop.f32.mrb[4].mxu0 }
 0x1b7   :  { %v254_v39 = vadd.f32 %v387_v37, %v253_v38  ;;  %v457_v40 = vpop.f32.mrb[5].mxu0 }
 0x1b8   :  { %v256_v41 = vpop.f32.mrb[6].mxu0 }
 0x1b9   :  { %v259_v42 = vmax.f32 %v254_v39, 0.0  ;;  %v458_v43 = vpop.f32.mrb[7].mxu0 }
 0x1bb   :  { %v260_v44 = vpack.c.bf16 %v259_v42, %v259_v42 }
 0x1bd   :  { %476 = vmatmul.mubr.bf16.vlgmr.msra.gmra.mrb[4].mxu1 %v260_v44 }
 0x290   :  { %v366_v46 = vpop.f32.mrb[4].mxu1 }
 0x291   :  { %v367_v47 = vadd.f32 %v396_v45, %v366_v46  ;;  %v477_v48 = vpop.f32.mrb[5].mxu1 }
 0x292   :  { %v369_v49 = vpop.f32.mrb[6].mxu1 }
 0x293   :  { %498 = vtanh.f32 %v367_v47  ;;  %v478_v51 = vpop.f32.mrb[7].mxu1 }
 0x29d   :  { %v499_v53 = vpop.eup %498 }
 0x29e   :  { %v376_v54 = vsel %vm374_vm4, %v499_v53, %v367_v47 }
 0x29f   :  { %378 = vst.msk [vmem:[%s659_s9] sm:$0xff] %vm377_vm5, %v376_v54 }

</bundles_post_ra>
